<compile_context>
chip_gen: v7x
topology: tpu7x:2x2x1
jax: 0.10.0
libtpu: 0.0.40
codegen_flags: <defaults>
</compile_context>

<pallas_src>
import functools
import math

import jax
import jax.numpy as jnp
from jax.experimental import pallas as pl
from jax.experimental.pallas import tpu as pltpu


_TARGET_BLOCK_BYTES = 2 * 1024 * 1024   # per-buffer VMEM block target
_FAST_PATH_ELEMS = 16384                # below this, plain XLA wins


def _zeroth_gamma_division_kernel(mask_ref, c_ref, o_ref, *, g):
    # mask_ref: (1, W) int32; 1 at packed positions holding a zeroth coeff.
    # c_ref/o_ref: (TILE_R, W) data tile.  Pure VPU work; hides under the DMA.
    c = c_ref[...]
    is_c0 = mask_ref[...] != 0                      # (1, W) -> broadcasts over sublanes
    o_ref[...] = jnp.where(is_c0, (c - 1.0) * g, c)


def zeroth_gamma_division(c, cep_order, gamma, *, force_pallas=False, block_rows=None):
    """Pallas implementation of ZerothGammaDivision.forward.

    c: array of shape (..., cep_order + 1).
    block_rows (test hook): rows per block; if smaller than the packed row
    count it must be a multiple of 8 (TPU sublane tiling).
    """
    if gamma == 0:
        raise ValueError("gamma must be non-zero")
    width = cep_order + 1
    assert c.shape[-1] == width, "last dim must be cep_order + 1"
    g = 1.0 / gamma

    # Tiny inputs: custom-call launch overhead dominates; let XLA fuse it.
    if c.size < _FAST_PATH_ELEMS and not force_pallas:
        c0 = (c[..., :1] - 1.0) * g
        return jnp.concatenate([c0, c[..., 1:]], axis=-1)

    orig_shape = c.shape
    rows = math.prod(orig_shape[:-1])   # static shape product, no device work

    # Lane-dense repack: fold k rows into one super-row of length k*width
    # (= lcm(width, 128), a multiple of 128).  Only when it's a free reshape.
    k = 128 // math.gcd(width, 128)
    if rows % k == 0:
        w_packed = width * k
        r = rows // k
    else:
        w_packed = width            # lane-sparse fallback, still tiled/pipelined
        r = rows
    c2d = c.reshape(r, w_packed)

    # Static zeroth-coefficient pattern within one packed row (computed once,
    # outside the kernel; resident in VMEM via a constant index_map).
    mask_row = (jnp.arange(w_packed, dtype=jnp.int32) % width == 0)
    mask_row = mask_row.astype(jnp.int32).reshape(1, w_packed)

    if block_rows is None:
        bytes_per_row = w_packed * c.dtype.itemsize
        block_rows = max(8, min(4096, (_TARGET_BLOCK_BYTES // bytes_per_row) // 8 * 8))
    tile_r = min(block_rows, r)     # if == r: full-dim block (exempt from 8-rule)

    grid = (pl.cdiv(r, tile_r),)
    out = pl.pallas_call(
        functools.partial(_zeroth_gamma_division_kernel, g=g),
        out_shape=jax.ShapeDtypeStruct((r, w_packed), c2d.dtype),
        grid_spec=pltpu.PrefetchScalarGridSpec(
            num_scalar_prefetch=0,
            grid=grid,
            in_specs=[
                pl.BlockSpec((1, w_packed), lambda i: (0, 0)),        # resident mask
                pl.BlockSpec((tile_r, w_packed), lambda i: (i, 0)),   # data tile
            ],
            out_specs=pl.BlockSpec((tile_r, w_packed), lambda i: (i, 0)),
        ),
        compiler_params=pltpu.CompilerParams(
            dimension_semantics=("parallel",),   # v7x: shard rows across both TCs
        ),
    )(mask_row, c2d)

    return out.reshape(orig_shape)


def _reference(c, cep_order, gamma):
    g = 1.0 / gamma
    c0 = (c[..., :1] - 1.0) * g
    return jnp.concatenate([c0, c[..., 1:]], axis=-1)


if __name__ == "__main__":
    # Case 1: small example consistent with the module (batch=2, frames=8,
    # cep_order=7) -> pure-JAX fast path.
    cep_order, gamma = 7, -0.5
    c_small = jax.random.normal(jax.random.PRNGKey(0), (2, 8, cep_order + 1),
                                dtype=jnp.float32)
    out = jax.block_until_ready(zeroth_gamma_division(c_small, cep_order, gamma))
    ref = _reference(c_small, cep_order, gamma)
    assert out.shape == c_small.shape and out.dtype == c_small.dtype
    assert jnp.allclose(out, ref, atol=1e-6, rtol=1e-6)

    # Case 2: Pallas lane-dense path.  rows=1024 divisible by k=16 -> packed
    # last dim 128; small block_rows forces multiple pipelined grid steps.
    c_dense = jax.random.normal(jax.random.PRNGKey(0), (4, 256, cep_order + 1),
                                dtype=jnp.float32)
    out = jax.block_until_ready(
        zeroth_gamma_division(c_dense, cep_order, gamma,
                              force_pallas=True, block_rows=16))
    ref = _reference(c_dense, cep_order, gamma)
    assert out.shape == c_dense.shape and out.dtype == c_dense.dtype
    assert jnp.allclose(out, ref, atol=1e-6, rtol=1e-6)

    # Case 3: Pallas lane-sparse fallback (width=25 -> k=128, rows=120 not
    # divisible), with a ragged final block (grid = cdiv(120, 32) = 4).
    cep_order2, gamma2 = 24, 0.5
    c_sparse = jax.random.normal(jax.random.PRNGKey(0), (3, 40, cep_order2 + 1),
                                 dtype=jnp.float32)
    out = jax.block_until_ready(
        zeroth_gamma_division(c_sparse, cep_order2, gamma2,
                              force_pallas=True, block_rows=32))
    ref = _reference(c_sparse, cep_order2, gamma2)
    assert out.shape == c_sparse.shape and out.dtype == c_sparse.dtype
    assert jnp.allclose(out, ref, atol=1e-6, rtol=1e-6)

    print("KERNEL_OK")
</pallas_src>

<mosaic_0001>
module attributes {stable_mosaic.version = 11 : i64} {
  func.func @_zeroth_gamma_division_kernel(%arg0: i32, %arg1: memref<1x128xi32, #tpu.memory_space<vmem>>, %arg2: memref<16x128xf32, #tpu.memory_space<vmem>>, %arg3: memref<16x128xf32, #tpu.memory_space<vmem>>) attributes {dimension_semantics = [#tpu.dimension_semantics<parallel>], iteration_bounds = array<i64: 4>, scalar_prefetch = 0 : i64, scratch_operands = 0 : i64, tpu.core_type = #tpu.core_type<tc>, window_params = [{pipeline_mode = #tpu.pipeline_mode<synchronous>, transform_indices = @transform_0, window_bounds = array<i64: 1, 128>}, {transform_indices = @transform_1, window_bounds = array<i64: 16, 128>}, {transform_indices = @transform_2, window_bounds = array<i64: 16, 128>}]} {
    %c0 = arith.constant 0 : index
    %c0_0 = arith.constant 0 : index
    %0 = vector.load %arg2[%c0, %c0_0] : memref<16x128xf32, #tpu.memory_space<vmem>>, vector<16x128xf32>
    %c0_1 = arith.constant 0 : index
    %c0_2 = arith.constant 0 : index
    %1 = vector.load %arg1[%c0_1, %c0_2] : memref<1x128xi32, #tpu.memory_space<vmem>>, vector<1x128xi32>
    %c0_i32 = arith.constant 0 : i32
    %2 = vector.broadcast %c0_i32 : i32 to vector<1x128xi32>
    %3 = arith.cmpi ne, %1, %2 : vector<1x128xi32>
    %cst = arith.constant 1.000000e+00 : f32
    %4 = vector.broadcast %cst : f32 to vector<16x128xf32>
    %5 = arith.subf %0, %4 : vector<16x128xf32>
    %cst_3 = arith.constant -2.000000e+00 : f32
    %6 = vector.broadcast %cst_3 : f32 to vector<16x128xf32>
    %7 = arith.mulf %5, %6 : vector<16x128xf32>
    %8 = vector.shape_cast %3 : vector<1x128xi1> to vector<1x128xi1>
    %9 = vector.broadcast %8 : vector<1x128xi1> to vector<16x128xi1>
    %10 = arith.select %9, %7, %0 : vector<16x128xi1>, vector<16x128xf32>
    %c0_4 = arith.constant 0 : index
    %c0_5 = arith.constant 0 : index
    %11 = vector.load %arg3[%c0_4, %c0_5] : memref<16x128xf32, #tpu.memory_space<vmem>>, vector<16x128xf32>
    tpu.vector_store %arg3[%c0_4, %c0_5], %10 {strides = array<i32>} : memref<16x128xf32, #tpu.memory_space<vmem>>, vector<16x128xf32>,
    return
  }
  func.func @transform_0(%arg0: i32) -> (i32, i32) {
    %c0_i32 = arith.constant 0 : i32
    %c0_i32_0 = arith.constant 0 : i32
    %c0_i32_1 = arith.constant 0 : i32
    return %c0_i32, %c0_i32_0 : i32, i32
  }
  func.func @transform_1(%arg0: i32) -> (i32, i32) {
    %c0_i32 = arith.constant 0 : i32
    %c0_i32_0 = arith.constant 0 : i32
    return %arg0, %c0_i32 : i32, i32
  }
  func.func @transform_2(%arg0: i32) -> (i32, i32) {
    %c0_i32 = arith.constant 0 : i32
    %c0_i32_0 = arith.constant 0 : i32
    return %arg0, %c0_i32 : i32, i32
  }
}

</mosaic_0001>

<bundles_post_ra>
// kernel: tpu_custom_call.1
= control target key start
LH: loop header
LB: loop body
LE: loop exit
PB: predicated region body
PF: predicated region fallthrough
CT: control target
= control target key end

     0   :  { %7 = vsyncpa [#allocation3], 0  ;;  %s725_s0 = inlined_call_operand.hbm [shape: s32[1,128], index: 0, kind: input, shape index: {}]   ;;  %s726_s1 = inlined_call_operand.hbm [shape: f32[64,128], index: 1, kind: input, shape index: {}]   ;;  %s727_s2 = inlined_call_operand.hbm [shape: f32[64,128], index: 2, kind: output, shape index: {}]  }
   0x1   :  { %8 = vsyncpa [#allocation6], 0 }
   0x2   :  { %10 = vsyncpa [#allocation6 + $0x1], 0 }
   0x3   :  { %11 = vsyncpa [#allocation4], 0 }
   0x4   :  { %13 = vsyncpa [#allocation4 + $0x1], 0  ;;  %s529_s9 = smov 0   ;;  %s531_s10 = smov 0  }
   0x5   :  { %s533_s11 = smov 0   ;;  %s535_s12 = smov 0  }
   0x6 LB: > { %s550_s13 = sadd.s32 4294967295, %s504_s12   ;;  %s294_s14 = sadd.s32 4294967294, %s504_s12   ;;  %s504_s12 = sphi %s535_s12, %s750_s12   ;;  %s500_s11 = sphi %s533_s11, %s749_s11   ;;  %s496_s10 = sphi %s531_s10, %s748_s10   ;;  %s492_s9 = sphi %s529_s9, %s747_s9  }
   0x7   : > { %s554_s15 = sadd.s32 1, %s504_s12   ;;  %s47_s16 = sadd.s32 1, %s500_s11 }
   0x8   : > { %s44_s17 = ssub.s32 %s504_s12, %s554_s15  ;;  %p54_p0 = scmp.ne.s32.totalorder %s500_s11, %s496_s10 }
   0x9   : > { %p45_p1 = scmp.eq.s32.totalorder %s44_s17, 0  ;;  %p55_p2 = scmp.eq.s32.totalorder %s504_s12, 0 }
   0xa   : > { %p60_p3 = scmp.ne.s32.totalorder %s496_s10, %s492_s9  ;;  %p728_p4 = scmp.eq.s32.totalorder %s550_s13, 0 }
   0xb   : > { %s566_s18 = scalar_select %p45_p1, %s500_s11, %s47_s16  }
   0xc   : > { %p568_p5 = por %p55_p2, %p54_p0  ;;  %p574_p6 = por %p728_p4, %p60_p3 }
   0xd   : > { %p84_p7 = scmp.eq.s32.totalorder %s550_s13, 3  ;;  %p90_p8 = scmp.eq.s32.totalorder %s294_s14, 3 }
   0xe   : > { %s734_s20 = scalar_select %p574_p6, 1, 0 }
   0xf   : > { %p295_p9 = scmp.ge.s32.totalorder %s504_s12, 1  ;;  %p97_p10 = scmp.lt.s32.totalorder %s504_s12, 5 }
  0x10   : > { %p581_p11 = por %p84_p7, %p54_p0  ;;  %p585_p12 = por %p90_p8, %p60_p3 }
  0x11   : > { %p589_p13 = pnand %p295_p9, %p97_p10  ;;  %s506_s24 = smov [#allocation2]  }
  0x12   : > { %s735_s21 = scalar_select %p581_p11, 1, 0 }
  0x13   : > { %s736_s22 = scalar_select %p585_p12, 1, 0 }
  0x14   : > { %s737_s23 = scalar_select %p589_p13, 1, 0 }
  0x15   : > { %p322_p1 = pneg %p589_p13  ;;  %s110_s25 = sshll.u32 %s506_s24, 4  ;;  %s111_s25 = int_to_ptr.vmem [resolvable:$true] %s110_s25 }
  0x16   : > { %p335_p2 = scmp.lt.s32.totalorder %s504_s12, 4  ;;  %s121_s27 = sand.u32 1, %s500_s11  }
  0x17   : > { %p598_p0 = pnand %p322_p1, %p728_p4  ;;  %s298_s29 = sshll.u32 %s121_s27, 4 }
  0x18   : > { %p605_p3 = pnand %p335_p2, %p568_p5  ;;  %s376_s4 = scalar_lea.hbm %s725_s0, 16 }
  0x19   : > { %p377_p7 = scmp.ne.s32.totalorder %s725_s0, %s376_s4  ;;  %p378_p8 = pneg %p598_p0 }
  0x1a   : > { %s739_s28 = scalar_select %p605_p3, 1, 0 }
  0x1b   : > { %p379_p9 = pnand %p378_p8, %p377_p7  ;;  %p383_p5 = scmp.lt.u32.totalorder %s376_s4, %s725_s0 }
  0x1d   : > { %p380_p10 = pneg %p379_p9 }
  0x1f   : > { %p385_p1 = pnand %p383_p5, %p380_p10 }
  0x21   : > { %388 = shalt.err (!%p385_p1)
}
  0x22   : > { %s389_s14 = scalar_lea.vmem %s111_s25, 16  ;;  %s396_s16 = scalar_lea.vmem %s111_s25, 32 }
  0x23   : > { %p390_p2 = scmp.ne.s32.totalorder %s111_s25, %s389_s14  ;;  %p397_p11 = scmp.lt.s32.totalorder %s111_s25, %s111_s25 }
  0x24   : > { %p398_p6 = scmp.lt.s32.totalorder %s396_s16, %s389_s14 }
  0x25   : > { %p392_p4 = pnand %p390_p2, %p378_p8 }
  0x26   : > { %p399_p13 = por %p398_p6, %p397_p11 }
  0x27   : > { %p393_p12 = pneg %p392_p4 }
  0x29   : > { %p400_p3 = pnand %p399_p13, %p393_p12 }
  0x2b   : > { %403 = shalt.err (!%p400_p3)
}
  0x2c   : > { %325 = dma.hbm_to_vmem [thread:$0]  (!%p598_p0), %s725_s0, 16, %s111_s25, [#allocation3]  }
  0x2d   : > { %s312_s24 = sshll.u32 %s504_s12, 8  ;;  %s125_s30 = scalar_lea.vmem [#allocation5], %s298_s29 }
  0x2e   : > { %s132_s3 = sshll.u32 %s125_s30, 4  ;;  %s629_s6 = scalar_lea.hbm %s726_s1, %s312_s24  ;;  %s631_s3 = int_to_ptr.vmem [resolvable:$true] %s132_s3 }
  0x2f   : > { %s633_s26 = scalar_lea.sflag [#allocation6], %s121_s27  ;;  %s404_s7 = scalar_lea.hbm %s629_s6, 256 }
  0x30   : > { %p405_p4 = scmp.ne.s32.totalorder %s629_s6, %s404_s7  ;;  %p740_p6 = scmp.ne.s32.totalorder %s739_s28, 0 }
  0x31   : > { %s409_s8 = scalar_lea.hbm %s726_s1, 1024  ;;  %p410_p0 = scmp.lt.u32.totalorder %s629_s6, %s726_s1 }
  0x32   : > { %p406_p11 = pneg %p740_p6  ;;  %p411_p3 = scmp.lt.u32.totalorder %s409_s8, %s404_s7 }
  0x33   : > { %p413_p8 = scmp.lt.u32.totalorder %s404_s7, %s629_s6 }
  0x34   : > { %p407_p12 = pnand %p406_p11, %p405_p4  ;;  %p412_p7 = por %p411_p3, %p410_p0 }
  0x36   : > { %p408_p13 = pneg %p407_p12  ;;  %p414_p9 = por %p413_p8, %p412_p7 }
  0x38   : > { %p415_p10 = pnand %p414_p9, %p408_p13 }
  0x3a   : > { %418 = shalt.err (!%p415_p10)
}
  0x3b   : > { %s419_s27 = scalar_lea.vmem %s631_s3, 256  ;;  %s507_s17 = smov [#allocation5]  }
  0x3c   : > { %p420_p5 = scmp.ne.s32.totalorder %s631_s3, %s419_s27  ;;  %s424_s19 = sshll.u32 %s507_s17, 4  ;;  %s425_s19 = int_to_ptr.vmem [resolvable:$false] %s424_s19 }
  0x3d   : > { %s426_s24 = scalar_lea.vmem %s425_s19, 512  ;;  %p427_p4 = scmp.lt.s32.totalorder %s631_s3, %s425_s19 }
  0x3e   : > { %p422_p1 = pnand %p420_p5, %p406_p11  ;;  %p428_p12 = scmp.lt.s32.totalorder %s426_s24, %s419_s27 }
  0x40   : > { %p423_p2 = pneg %p422_p1  ;;  %p429_p0 = por %p428_p12, %p427_p4 }
  0x42   : > { %p430_p3 = pnand %p429_p0, %p423_p2 }
  0x44   : > { %433 = shalt.err (!%p430_p3)
}
  0x45   : > { %s508_s30 = smov 128   ;;  %s509_s4 = smov 8  }
  0x46   : > { %329 = dma.hbm_to_vmem [thread:$0]  (!%p740_p6), %s629_s6, 256, %s631_s3, %s633_s26, %s508_s30, %s508_s30, %s509_s4  }
  0x47   : > { %p741_p11 = scmp.ne.s32.totalorder %s737_s23, 0 }
  0x48   : > { %p742_p13 = scmp.eq.s32.totalorder (!%p741_p11), %s550_s13, 0 }
  0x49   : > { %144 = sbr.rel (%p741_p11) target bundleno = 112 (0x70), region = 28 }
  0x50   : > { %479 = dma.done.wait (%p742_p13), [#allocation3], 16   ;;  %p743_p7 = pmov %p742_p13 }
  0x51   : > { %s668_s5 = sand.u32 1, %s496_s10   ;;  %p744_p8 = scmp.ne.s32.totalorder %s734_s20, 0 }
  0x52   : > { %481 = vsyncadd (%p743_p7), [#allocation3], 4294967280  ;;  %s303_s7 = sshll.u32 %s668_s5, 4  ;;  %s151_s25 = scalar_lea.sflag [#allocation6], %s668_s5 }
  0x53   : > { %s154_s29 = scalar_lea.vmem [#allocation5], %s303_s7 }
  0x54   : > { %483 = dma.done.wait (%p744_p8), %s151_s25, 256  }
  0x55   : > { %485 = vsyncadd (%p744_p8), %s151_s25, 4294967040  ;;  %v186_v0 = vlaneseq  ;;  %v177_v3 = vld [vmem:[%s154_s29] sm:$0xff]  ;;  %v179_v4 = vld [vmem:[#allocation2] sm:$0x1]  ;;  %s174_s23 = scalar_lea.vmem [#allocation7], %s303_s7  ;;  %s313_s3 = sshll.u32 %s550_s13, 8 }
  0x56   : > { %v178_v5 = vld [vmem:[%s154_s29 + $0x8] sm:$0xff]  ;;  %vm180_vm0 = vcmp.ne.s32.totalorder %v179_v4, 0  ;;  %v305_v6 = vadd.f32 -1.0, %v177_v3  ;;  %s209_s28 = sshll.u32 %s174_s23, 4  ;;  %v510_v8 = vmov 0   ;;  %s682_s26 = scalar_lea.hbm %s727_s2, %s313_s3  ;;  %s677_s28 = int_to_ptr.vmem [resolvable:$true] %s209_s28 }
  0x57   : > { %v187_v1 = vshrl.u32 %v186_v0, 7  ;;  %v306_v7 = vadd.f32 -1.0, %v178_v5  ;;  %v185_v9 = vsel %vm180_vm0, 1, %v510_v8  ;;  %s196_s13 = scalar_lea.sflag [#allocation4], %s668_s5  ;;  %s434_s8 = scalar_lea.vmem %s677_s28, 256 }
  0x58   : > { %v183_v10 = vmul.f32 -2.0, %v305_v6  ;;  %p435_p6 = scmp.ne.s32.totalorder %s677_s28, %s434_s8  ;;  %p745_p9 = scmp.ne.s32.totalorder %s735_s21, 0 }
  0x59   : > { %v188_v2 = vsub.s32 0, %v187_v1  ;;  %v184_v12 = vmul.f32 -2.0, %v306_v7  ;;  %s511_s14 = smov [#allocation7]  }
  0x5a   : > { %p436_p10 = pnand %p435_p6, %p745_p9  ;;  %s438_s16 = sshll.u32 %s511_s14, 4  ;;  %s439_s16 = int_to_ptr.vmem [resolvable:$false] %s438_s16 }
  0x5b   : > { %v189_v11 = vrot.slane %v185_v9, %v188_v2  ;;  %s440_s27 = scalar_lea.vmem %s439_s16, 512  ;;  %p441_p1 = scmp.lt.s32.totalorder %s677_s28, %s439_s16 }
  0x5c   : > { %p437_p5 = pneg %p436_p10  ;;  %p442_p2 = scmp.lt.s32.totalorder %s440_s27, %s434_s8 }
  0x5d   : > { %vm190_vm1 = vcmp.eq.s32.totalorder %v189_v11, 1 }
  0x5e   : > { %v191_v13 = vsel %vm190_vm1, %v183_v10, %v177_v3  ;;  %v192_v14 = vsel %vm190_vm1, %v184_v12, %v178_v5  ;;  %p443_p4 = por %p442_p2, %p441_p1 }
  0x5f   : > { %193 = vst [vmem:[%s174_s23] sm:$0xff] %v191_v13  ;;  %194 = vst [vmem:[%s174_s23 + $0x8] sm:$0xff] %v192_v14 }
  0x60   : > { %p444_p12 = pnand %p443_p4, %p437_p5 }
  0x62   : > { %447 = shalt.err (!%p444_p12)
}
  0x63   : > { %s448_s17 = scalar_lea.hbm %s682_s26, 256  ;;  %s452_s30 = scalar_lea.hbm %s727_s2, 1024 }
  0x64   : > { %p449_p0 = scmp.ne.s32.totalorder %s682_s26, %s448_s17  ;;  %p453_p13 = scmp.lt.u32.totalorder %s682_s26, %s727_s2 }
  0x65   : > { %p454_p7 = scmp.lt.u32.totalorder %s452_s30, %s448_s17  ;;  %p456_p6 = scmp.lt.u32.totalorder %s448_s17, %s682_s26 }
  0x66   : > { %p450_p3 = pnand %p449_p0, %p745_p9 }
  0x67   : > { %p455_p8 = por %p454_p7, %p453_p13 }
  0x68   : > { %p451_p11 = pneg %p450_p3 }
  0x69   : > { %p457_p10 = por %p456_p6, %p455_p8 }
  0x6b   : > { %p458_p5 = pnand %p457_p10, %p451_p11 }
  0x6d   : > { %461 = shalt.err (!%p458_p5)
}
  0x6e   : > { %s512_s25 = smov 128   ;;  %s513_s29 = smov 8  }
  0x6f   : > { %320 = dma.vmem_to_hbm [thread:$0]  (%p745_p9), %s677_s28, 256, %s682_s26, %s196_s13, %s512_s25, %s512_s25, %s513_s29  }
  0x70 PF: > { %p337_p1 = scmp.ge.s32.totalorder %s504_s12, 2  ;;  %s224_s23 = sand.u32 1, %s492_s9  }
  0x71   : > { %p746_p2 = scmp.ne.s32.totalorder %s736_s22, 0  ;;  %s225_s3 = scalar_lea.sflag [#allocation4], %s224_s23 }
  0x73   : > { %p331_p4 = pnand %p337_p1, %p746_p2 }
  0x75   : > { %487 = dma.done.wait (!%p331_p4), %s225_s3, 256  }
  0x76   : > { %489 = vsyncadd (!%p331_p4), %s225_s3, 4294967040  ;;  %p16_p12 = scmp.ge.s32.totalorder %s554_s15, 6   ;;  %s747_s9 = smov %s496_s10 }
  0x77   : > { %s748_s10 = smov %s500_s11  ;;  %s749_s11 = smov %s566_s18 }
  0x78   : > { %s750_s12 = smov %s554_s15  ;;  %18 = sbr.rel (!%p16_p12) target bundleno = 6 (0x6), region = 78 }
  0x7f   :  { %230 = vsyncpa [#allocation3], 1 }
  0x80   :  { %232 = vsyncpa [#allocation3 + $0x1], 1 }
  0x81   :  { %233 = vsyncpa [#allocation6], 1 }
  0x82   :  { %235 = vsyncpa [#allocation6 + $0x1], 1 }
  0x83   :  { %236 = vsyncpa [#allocation4], 1 }
  0x84   :  { %238 = vsyncpa [#allocation4 + $0x1], 1 }

</bundles_post_ra>
